<compile_context>
chip_gen: v5e
topology: v5e:2x2
jax: 0.10.0
libtpu: 0.0.40
codegen_flags: <defaults>
</compile_context>

<pallas_src>
import functools
import math

import jax
import jax.numpy as jnp
from jax.experimental import pallas as pl
from jax.experimental.pallas import tpu as pltpu


def _round_up(x, m):
    return ((x + m - 1) // m) * m


# ----------------------------------------------------------------------------
# Pallas kernels
# ----------------------------------------------------------------------------
def _gemm_bias_act_kernel(a_ref, b_ref, c_ref, o_ref, acc_ref, *, relu):
    """K-tiled: acc += A@B ; on last k: out = act(acc + bias)."""
    @pl.when(pl.program_id(2) == 0)
    def _():
        acc_ref[...] = jnp.zeros_like(acc_ref)

    acc_ref[...] += jnp.dot(a_ref[...], b_ref[...],
                            preferred_element_type=jnp.float32)

    @pl.when(pl.program_id(2) == pl.num_programs(2) - 1)
    def _():
        y = acc_ref[...] + c_ref[...]
        if relu:
            y = jnp.maximum(y, 0.0)
        o_ref[...] = y.astype(o_ref.dtype)


def _gemm_bias_res_act_kernel(a_ref, b_ref, c_ref, r_ref, o_ref, acc_ref, *, relu):
    """K-tiled: acc += A@B ; on last k: out = act(acc + bias + residual)."""
    @pl.when(pl.program_id(2) == 0)
    def _():
        acc_ref[...] = jnp.zeros_like(acc_ref)

    acc_ref[...] += jnp.dot(a_ref[...], b_ref[...],
                            preferred_element_type=jnp.float32)

    @pl.when(pl.program_id(2) == pl.num_programs(2) - 1)
    def _():
        y = acc_ref[...] + c_ref[...] + r_ref[...].astype(jnp.float32)
        if relu:
            y = jnp.maximum(y, 0.0)
        o_ref[...] = y.astype(o_ref.dtype)


def _maxpool_kernel(*refs):
    # refs = 9 shifted-window inputs (tm, C) + 1 output (tm, C): elementwise max.
    o_ref = refs[-1]
    m = refs[0][...]
    for r in refs[1:-1]:
        m = jnp.maximum(m, r[...])
    o_ref[...] = m


def _head_kernel(x_ref, w_ref, b_ref, o_ref):
    # x_ref: (B, H*W, C) -> global average pool over H*W, then Linear.
    feat = jnp.mean(x_ref[...].astype(jnp.float32), axis=1)              # (B, C)
    o_ref[...] = jnp.dot(feat, w_ref[...],
                         preferred_element_type=jnp.float32) + b_ref[...]


# ----------------------------------------------------------------------------
# Tile selection
# ----------------------------------------------------------------------------
def _pick_tile_m(M):
    # Largest tile (<=512) whose padding waste is <=128 rows.  All candidates are
    # multiples of 64 (>= the (8/16,128) sublane tiling).
    for tm in (512, 448, 384, 320, 256, 192, 128):
        if pl.cdiv(M, tm) * tm - M <= 128:
            return tm
    return 128


def _pick_tile_n(Np, m_tiles):
    if Np <= 128:
        return Np
    tn = 256 if Np % 256 == 0 else 128
    # Keep at least 2 grid tiles per call so both v7x TensorCores get work.
    if m_tiles == 1 and Np // tn < 2:
        tn = 128
    return tn


def _pick_tile_k(Kp):
    if Kp <= 1024:
        return Kp
    for tk in (512, 384, 256, 128):
        if Kp % tk == 0:
            return tk
    return 128


# ----------------------------------------------------------------------------
# Pallas wrappers
# ----------------------------------------------------------------------------
def matmul_bias_act(a, b, bias, residual=None, relu=True, out_dtype=jnp.bfloat16):
    """a: (M,K) bf16, b: (K,N) bf16, bias: (N,) f32, residual: (M,N) bf16 or None."""
    M, K = a.shape
    N = b.shape[1]

    Kp = _round_up(K, 128)
    tm = _pick_tile_m(M)
    Mp = pl.cdiv(M, tm) * tm
    Np = _round_up(N, 128)
    tn = _pick_tile_n(Np, Mp // tm)
    tk = _pick_tile_k(Kp)

    a_p = a if (Mp == M and Kp == K) else jnp.pad(a, ((0, Mp - M), (0, Kp - K)))
    b_p = b if (Kp == K and Np == N) else jnp.pad(b, ((0, Kp - K), (0, Np - N)))
    c_p = (bias if Np == N else jnp.pad(bias, (0, Np - N)))
    c_p = c_p.reshape(1, Np).astype(jnp.float32)

    in_specs = [
        pl.BlockSpec((tm, tk), lambda i, j, k: (i, k)),
        pl.BlockSpec((tk, tn), lambda i, j, k: (k, j)),
        pl.BlockSpec((1, tn), lambda i, j, k: (0, j)),
    ]
    inputs = [a_p, b_p, c_p]
    if residual is not None:
        r_p = residual if (Mp == M and Np == N) else jnp.pad(
            residual, ((0, Mp - M), (0, Np - N)))
        in_specs.append(pl.BlockSpec((tm, tn), lambda i, j, k: (i, j)))
        inputs.append(r_p)
        kernel = functools.partial(_gemm_bias_res_act_kernel, relu=relu)
    else:
        kernel = functools.partial(_gemm_bias_act_kernel, relu=relu)

    out = pl.pallas_call(
        kernel,
        out_shape=jax.ShapeDtypeStruct((Mp, Np), out_dtype),
        grid=(Mp // tm, Np // tn, Kp // tk),
        in_specs=in_specs,
        out_specs=pl.BlockSpec((tm, tn), lambda i, j, k: (i, j)),
        scratch_shapes=[pltpu.VMEM((tm, tn), jnp.float32)],
        compiler_params=pltpu.CompilerParams(
            dimension_semantics=("parallel", "parallel", "arbitrary")),
    )(*inputs)
    if Mp == M and Np == N:
        return out
    return out[:M, :N]


def _extract_patches(x, kh, kw, stride, pad):
    """x: (B,H,W,C) bf16 -> (B,Ho,Wo,kh*kw*C), patch order (ki, kj, c)."""
    B, H, W, C = x.shape
    xp = jnp.pad(x, ((0, 0), (pad, pad), (pad, pad), (0, 0)))
    Ho = (H + 2 * pad - kh) // stride + 1
    Wo = (W + 2 * pad - kw) // stride + 1
    cols = []
    for i in range(kh):
        for j in range(kw):
            cols.append(xp[:, i:i + stride * Ho:stride, j:j + stride * Wo:stride, :])
    return jnp.concatenate(cols, axis=-1)


def conv2d_bn_act(x, w, bias, stride=1, pad=0, residual=None, relu=True):
    """x: (B,H,W,Cin) bf16, w: (kh,kw,Cin,Cout) bf16 (BN scale pre-folded), bias: (Cout,) f32."""
    kh, kw, cin, cout = w.shape
    if kh == 1 and kw == 1 and pad == 0:
        patches = x[:, ::stride, ::stride, :]
    else:
        patches = _extract_patches(x, kh, kw, stride, pad)
    B, Ho, Wo, K = patches.shape
    a = patches.reshape(B * Ho * Wo, K)
    bmat = w.reshape(kh * kw * cin, cout)
    r = None if residual is None else residual.reshape(B * Ho * Wo, cout)
    y = matmul_bias_act(a, bmat, bias, residual=r, relu=relu,
                        out_dtype=jnp.bfloat16)
    return y.reshape(B, Ho, Wo, cout)


def maxpool_3x3_s2(x):
    """MaxPool (1,3,3) stride (1,2,2) pad (0,1,1) on (B,H,W,C) (temporal dim folded away)."""
    B, H, W, C = x.shape
    xp = jnp.pad(x, ((0, 0), (1, 1), (1, 1), (0, 0)), constant_values=-jnp.inf)
    Ho = (H + 2 - 3) // 2 + 1
    Wo = (W + 2 - 3) // 2 + 1
    M = B * Ho * Wo

    views = []
    for i in range(3):
        for j in range(3):
            views.append(
                xp[:, i:i + 2 * Ho:2, j:j + 2 * Wo:2, :].reshape(M, C))

    tm = _pick_tile_m(M)
    Mp = pl.cdiv(M, tm) * tm
    if Mp != M:
        views = [jnp.pad(v, ((0, Mp - M), (0, 0))) for v in views]

    out = pl.pallas_call(
        _maxpool_kernel,
        out_shape=jax.ShapeDtypeStruct((Mp, C), x.dtype),
        grid=(Mp // tm,),
        in_specs=[pl.BlockSpec((tm, C), lambda i: (i, 0))] * 9,
        out_specs=pl.BlockSpec((tm, C), lambda i: (i, 0)),
        compiler_params=pltpu.CompilerParams(dimension_semantics=("parallel",)),
    )(*views)
    if Mp != M:
        out = out[:M]
    return out.reshape(B, Ho, Wo, C)


def avgpool_fc(x, w, b):
    """x: (B,7,7,512) bf16 -> AvgPool2d(7) + Linear, fused in one Pallas kernel."""
    B, H, W, C = x.shape
    N = w.shape[1]
    Np = _round_up(N, 128)
    w_p = jnp.pad(w, ((0, 0), (0, Np - N))).astype(jnp.float32)
    b_p = jnp.pad(b, (0, Np - N)).reshape(1, Np).astype(jnp.float32)
    xr = x.reshape(B, H * W, C)

    out = pl.pallas_call(
        _head_kernel,
        out_shape=jax.ShapeDtypeStruct((B, Np), jnp.float32),
        grid=(1,),
        in_specs=[
            pl.BlockSpec((B, H * W, C), lambda i: (0, 0, 0)),
            pl.BlockSpec((C, Np), lambda i: (0, 0)),
            pl.BlockSpec((1, Np), lambda i: (0, 0)),
        ],
        out_specs=pl.BlockSpec((B, Np), lambda i: (0, 0)),
    )(xr, w_p, b_p)
    return out[:, :N]


# ----------------------------------------------------------------------------
# Parameters (deterministic synthetic init mirroring the module's __init__)
# ----------------------------------------------------------------------------
def _kaiming_conv(key, kh, kw, cin, cout):
    fan_out = kh * kw * cout  # kaiming_normal_(mode='fan_out', nonlinearity='relu')
    std = math.sqrt(2.0 / fan_out)
    return jax.random.normal(key, (kh, kw, cin, cout), jnp.float32) * std


def _fold_bn(w_f32, cout, eps=1e-5):
    """Eval-mode BN (gamma=1, beta=0, mean=0, var=1) folded into the conv weight."""
    gamma = jnp.ones((cout,), jnp.float32)
    beta = jnp.zeros((cout,), jnp.float32)
    mean = jnp.zeros((cout,), jnp.float32)
    var = jnp.ones((cout,), jnp.float32)
    scale = gamma / jnp.sqrt(var + eps)
    bias = beta - mean * scale
    w_folded = (w_f32 * scale[None, None, None, :]).astype(jnp.bfloat16)
    return w_folded, bias


def make_params(key, layers=(1, 1, 1, 1), num_classes=174):
    keys = iter(jax.random.split(key, 64))
    p = {}
    p['conv1_w'], p['bn1_b'] = _fold_bn(_kaiming_conv(next(keys), 7, 7, 3, 64), 64)

    inplanes = 64
    layer_list = []
    for planes, nblocks, stride in zip((64, 128, 256, 512), layers, (1, 2, 2, 2)):
        blocks = []
        for bi in range(nblocks):
            s = stride if bi == 0 else 1
            bp = {'stride': s}
            bp['conv1_w'], bp['bn1_b'] = _fold_bn(
                _kaiming_conv(next(keys), 3, 3, inplanes, planes), planes)
            bp['conv2_w'], bp['bn2_b'] = _fold_bn(
                _kaiming_conv(next(keys), 3, 3, planes, planes), planes)
            if s != 1 or inplanes != planes:  # BasicBlock expansion = 1
                bp['down_w'], bp['dbn_b'] = _fold_bn(
                    _kaiming_conv(next(keys), 1, 1, inplanes, planes), planes)
            inplanes = planes
            blocks.append(bp)
        layer_list.append(blocks)
    p['layers'] = layer_list

    bound = 1.0 / math.sqrt(512)  # nn.Linear default init
    p['fc_w'] = jax.random.uniform(next(keys), (512, num_classes), jnp.float32, -bound, bound)
    p['fc_b'] = jax.random.uniform(next(keys), (num_classes,), jnp.float32, -bound, bound)
    return p


# ----------------------------------------------------------------------------
# Forward pass
# ----------------------------------------------------------------------------
def basic_block(x, bp):
    s = bp['stride']
    identity = x
    out = conv2d_bn_act(x, bp['conv1_w'], bp['bn1_b'], stride=s, pad=1, relu=True)
    if 'down_w' in bp:
        identity = conv2d_bn_act(x, bp['down_w'], bp['dbn_b'], stride=s, pad=0, relu=False)
    # conv2 + BN + residual-add + ReLU all fused in one Pallas GEMM epilogue.
    out = conv2d_bn_act(out, bp['conv2_w'], bp['bn2_b'], stride=1, pad=1,
                        residual=identity, relu=True)
    return out


def resnet_forward(params, x_ncthw):
    N, C, T, H, W = x_ncthw.shape
    # NCTHW -> (N*T, H, W, C); matches PyTorch's final transpose(1,2).view((-1,)+...)
    x = jnp.transpose(x_ncthw, (0, 2, 3, 4, 1)).reshape(N * T, H, W, C)
    x = x.astype(jnp.bfloat16)

    x = conv2d_bn_act(x, params['conv1_w'], params['bn1_b'], stride=2, pad=3, relu=True)
    x = maxpool_3x3_s2(x)
    for layer in params['layers']:
        for bp in layer:
            x = basic_block(x, bp)
    # x: (N*T, 7, 7, 512) -> AvgPool2d(7) + new_fc
    return avgpool_fc(x, params['fc_w'], params['fc_b'])


# ----------------------------------------------------------------------------
if __name__ == "__main__":
    key = jax.random.PRNGKey(0)
    pkey, xkey = jax.random.split(key)

    params = make_params(pkey, layers=(1, 1, 1, 1), num_classes=174)

    # Input must be 224x224 spatially so layer4 output is 7x7 (AvgPool2d(7) -> 1x1),
    # as the module's fc(512*expansion) requires.  Keep batch/time small: N=1, T=2.
    x = jax.random.normal(xkey, (1, 3, 2, 224, 224), jnp.float32)

    out = resnet_forward(params, x)
    out = jax.block_until_ready(out)
    assert out.shape == (2, 174), out.shape
    assert jnp.all(jnp.isfinite(out))
    print("KERNEL_OK")
</pallas_src>

<mosaic_0001>
module attributes {stable_mosaic.version = 11 : i64} {
  func.func @_gemm_bias_act_kernel(%arg0: i32, %arg1: i32, %arg2: i32, %arg3: memref<512x256xbf16, #tpu.memory_space<vmem>>, %arg4: memref<256x128xbf16, #tpu.memory_space<vmem>>, %arg5: memref<1x128xf32, #tpu.memory_space<vmem>>, %arg6: memref<512x128xbf16, #tpu.memory_space<vmem>>, %arg7: memref<512x128xf32, #tpu.memory_space<vmem>>) attributes {dimension_semantics = [#tpu.dimension_semantics<parallel>, #tpu.dimension_semantics<parallel>, #tpu.dimension_semantics<arbitrary>], iteration_bounds = array<i64: 49, 1, 1>, scalar_prefetch = 0 : i64, scratch_operands = 1 : i64, tpu.core_type = #tpu.core_type<tc>, window_params = [{transform_indices = @transform_0, window_bounds = array<i64: 512, 256>}, {transform_indices = @transform_1, window_bounds = array<i64: 256, 128>}, {transform_indices = @transform_2, window_bounds = array<i64: 1, 128>}, {transform_indices = @transform_3, window_bounds = array<i64: 512, 128>}]} {
    %c0_i32 = arith.constant 0 : i32
    %0 = arith.cmpi eq, %arg2, %c0_i32 : i32
    %1 = arith.extui %0 : i1 to i32
    %c0_i32_0 = arith.constant 0 : i32
    %2 = arith.cmpi ne, %1, %c0_i32_0 : i32
    scf.if %2 {
      %cst_10 = arith.constant 0.000000e+00 : f32
      %12 = vector.broadcast %cst_10 : f32 to vector<512x128xf32>
      %c0_11 = arith.constant 0 : index
      %c0_12 = arith.constant 0 : index
      %13 = vector.load %arg7[%c0_11, %c0_12] : memref<512x128xf32, #tpu.memory_space<vmem>>, vector<512x128xf32>
      tpu.vector_store %arg7[%c0_11, %c0_12], %12 {strides = array<i32>} : memref<512x128xf32, #tpu.memory_space<vmem>>, vector<512x128xf32>,
    } else {
    }
    %c0 = arith.constant 0 : index
    %c0_1 = arith.constant 0 : index
    %3 = vector.load %arg7[%c0, %c0_1] : memref<512x128xf32, #tpu.memory_space<vmem>>, vector<512x128xf32>
    %c0_2 = arith.constant 0 : index
    %c0_3 = arith.constant 0 : index
    %4 = vector.load %arg3[%c0_2, %c0_3] : memref<512x256xbf16, #tpu.memory_space<vmem>>, vector<512x256xbf16>
    %c0_4 = arith.constant 0 : index
    %c0_5 = arith.constant 0 : index
    %5 = vector.load %arg4[%c0_4, %c0_5] : memref<256x128xbf16, #tpu.memory_space<vmem>>, vector<256x128xbf16>
    %cst = arith.constant dense<0.000000e+00> : vector<512x128xf32>
    %6 = tpu.matmul %4, %5, %cst {dimension_numbers = #tpu.dot_dimension_numbers<[1], [0], [0], [1], [0, 0, 1, 1], [], []>} : vector<512x256xbf16>, vector<256x128xbf16>, vector<512x128xf32> -> vector<512x128xf32>
    %7 = arith.addf %3, %6 : vector<512x128xf32>
    %c0_6 = arith.constant 0 : index
    %c0_7 = arith.constant 0 : index
    %8 = vector.load %arg7[%c0_6, %c0_7] : memref<512x128xf32, #tpu.memory_space<vmem>>, vector<512x128xf32>
    tpu.vector_store %arg7[%c0_6, %c0_7], %7 {strides = array<i32>} : memref<512x128xf32, #tpu.memory_space<vmem>>, vector<512x128xf32>,
    %c0_i32_8 = arith.constant 0 : i32
    %9 = arith.cmpi eq, %arg2, %c0_i32_8 : i32
    %10 = arith.extui %9 : i1 to i32
    %c0_i32_9 = arith.constant 0 : i32
    %11 = arith.cmpi ne, %10, %c0_i32_9 : i32
    scf.if %11 {
      %c0_10 = arith.constant 0 : index
      %c0_11 = arith.constant 0 : index
      %12 = vector.load %arg7[%c0_10, %c0_11] : memref<512x128xf32, #tpu.memory_space<vmem>>, vector<512x128xf32>
      %c0_12 = arith.constant 0 : index
      %c0_13 = arith.constant 0 : index
      %13 = vector.load %arg5[%c0_12, %c0_13] : memref<1x128xf32, #tpu.memory_space<vmem>>, vector<1x128xf32>
      %14 = vector.broadcast %13 : vector<1x128xf32> to vector<512x128xf32>
      %15 = arith.addf %12, %14 : vector<512x128xf32>
      %cst_14 = arith.constant 0.000000e+00 : f32
      %16 = vector.broadcast %cst_14 : f32 to vector<512x128xf32>
      %17 = arith.maximumf %15, %16 : vector<512x128xf32>
      %18 = arith.truncf %17 : vector<512x128xf32> to vector<512x128xbf16>
      %c0_15 = arith.constant 0 : index
      %c0_16 = arith.constant 0 : index
      %19 = vector.load %arg6[%c0_15, %c0_16] : memref<512x128xbf16, #tpu.memory_space<vmem>>, vector<512x128xbf16>
      tpu.vector_store %arg6[%c0_15, %c0_16], %18 {strides = array<i32>} : memref<512x128xbf16, #tpu.memory_space<vmem>>, vector<512x128xbf16>,
    } else {
    }
    return
  }
  func.func @transform_0(%arg0: i32, %arg1: i32, %arg2: i32) -> (i32, i32) {
    %c0_i32 = arith.constant 0 : i32
    return %arg0, %arg2 : i32, i32
  }
  func.func @transform_1(%arg0: i32, %arg1: i32, %arg2: i32) -> (i32, i32) {
    %c0_i32 = arith.constant 0 : i32
    return %arg2, %arg1 : i32, i32
  }
  func.func @transform_2(%arg0: i32, %arg1: i32, %arg2: i32) -> (i32, i32) {
    %c0_i32 = arith.constant 0 : i32
    %c0_i32_0 = arith.constant 0 : i32
    return %c0_i32, %arg1 : i32, i32
  }
  func.func @transform_3(%arg0: i32, %arg1: i32, %arg2: i32) -> (i32, i32) {
    %c0_i32 = arith.constant 0 : i32
    return %arg0, %arg1 : i32, i32
  }
}

</mosaic_0001>

<bundles_post_ra>
// kernel: tpu_custom_call.1
= control target key start
LH: loop header
LB: loop body
LE: loop exit
PB: predicated region body
PF: predicated region fallthrough
CT: control target
= control target key end

     0   :  { %s3146_s0 = inlined_call_operand.hbm [shape: bf16[25088,256], index: 0, kind: input, shape index: {}]   ;;  %s3147_s1 = inlined_call_operand.hbm [shape: bf16[256,128], index: 1, kind: input, shape index: {}]   ;;  %s3148_s2 = inlined_call_operand.hbm [shape: f32[1,128], index: 2, kind: input, shape index: {}]   ;;  %s3149_s3 = inlined_call_operand.hbm [shape: bf16[25088,128], index: 3, kind: output, shape index: {}]  }
   0x1   :  { %3150 = sst [smem:[#allocation13_spill]] %s3147_s1 }
   0x2   :  { %8 = vsyncpa [#allocation4], 0 }
   0x3   :  { %10 = vsyncpa [#allocation4 + $0x1], 0 }
   0x4   :  { %11 = vsyncpa [#allocation7], 0 }
   0x5   :  { %12 = vsyncpa [#allocation5], 0 }
   0x6   :  { %14 = vsyncpa [#allocation5 + $0x1], 0  ;;  %s2762_s12 = smov 0   ;;  %s2764_s13 = smov 0  }
   0x7   :  { %s2766_s14 = smov 0   ;;  %s2768_s15 = smov 0  }
   0x8   :  { %s2770_s16 = smov 0   ;;  %s2772_s17 = smov 0  }
   0x9 LB: > { %s1836_s18 = sadd.s32 4294967295, %s2732_s17   ;;  %s1837_s19 = sadd.s32 4294967294, %s2732_s17   ;;  %s2732_s17 = sphi %s2772_s17, %s20_s17   ;;  %s2728_s16 = sphi %s2770_s16, %s3163_s16   ;;  %s2724_s15 = sphi %s2768_s15, %s3162_s15   ;;  %s2720_s14 = sphi %s2766_s14, %s3161_s14   ;;  %s2716_s13 = sphi %s2764_s13, %s3160_s13   ;;  %s2712_s12 = sphi %s2762_s12, %s3159_s12  }
   0xa   : > { %p61_p0 = scmp.ne.s32.totalorder %s2716_s13, %s2712_s12  ;;  %p2796_p1 = scmp.eq.s32.totalorder %s1836_s18, 0 }
   0xb   : > { %p2800_p2 = scmp.eq.s32.totalorder %s1836_s18, 48  ;;  %p147_p3 = scmp.eq.s32.totalorder %s1837_s19, 48 }
   0xc   : > { %p2806_p4 = por %p2796_p1, %p61_p0  ;;  %p1838_p5 = scmp.ge.s32.totalorder %s2732_s17, 1 }
   0xd   : > { %p2811_p6 = por %p147_p3, %p61_p0  ;;  %p154_p7 = scmp.lt.s32.totalorder %s2732_s17, 50 }
   0xe   : > { %s3155_s1 = sld [smem:[#allocation13_spill]]  ;;  %s2734_s28 = smov [#allocation6]  }
   0xf   : > { %p2819_p8 = pnand %p1838_p5, %p154_p7  ;;  %s171_s29 = sshll.u32 %s2734_s28, 4  ;;  %s172_s29 = int_to_ptr.vmem [resolvable:$true] %s171_s29 }
  0x10   : > { %s185_s5 = sshll.u32 %s3148_s2, 4  ;;  %s2735_s6 = smov 64   ;;  %s186_s5 = int_to_ptr.hbm [resolvable:$true] %s185_s5 }
  0x11   : > { %p2478_p9 = pneg %p2819_p8  ;;  %s2736_s7 = smov 4  }
  0x12   : > { %s2737_s8 = smov [#allocation8]   ;;  %s39_s10 = sadd.s32 1, %s2728_s16 }
  0x13   : > { %p2479_p10 = pnand %p2478_p9, %p2796_p1  ;;  %s187_s9 = sshll.u32 %s2737_s8, 4  ;;  %s188_s9 = int_to_ptr.vmem [resolvable:$true] %s187_s9 }
  0x14   : > { %s169_s26 = sshll.u32 %s3155_s1, 4  ;;  %s48_s11 = sadd.s32 1, %s2720_s14  ;;  %s170_s26 = int_to_ptr.hbm [resolvable:$true] %s169_s26 }
  0x15   : > { %2481 = dma.hbm_to_vmem [thread:$0]  (!%p2479_p10), %s170_s26, 2048, %s172_s29, [#allocation7], %s2735_s6, %s2735_s6, %s2736_s7  }
  0x16   : > { %2484 = dma.hbm_to_vmem [thread:$0]  (!%p2479_p10), %s186_s5, 16, %s188_s9, [#allocation7]  }
  0x17   : > { %p41_p11 = scmp.ge.s32.totalorder %s39_s10, 49  ;;  %p55_p12 = scmp.ne.s32.totalorder %s2720_s14, %s2716_s13 }
  0x18   : > { %p56_p13 = scmp.eq.s32.totalorder %s2732_s17, 0  ;;  %p2495_p0 = scmp.lt.s32.totalorder %s2732_s17, 49 }
  0x19   : > { %s3165_s10 = smov (%p41_p11, %s39_s10), 0  ;;  %p2844_p5 = por %p2800_p2, %p55_p12 }
  0x1a   : > { %p2838_p3 = por %p56_p13, %p55_p12  ;;  %s43_s24 = ssub.s32 %s2728_s16, %s3165_s10 }
  0x1b   : > { %s198_s25 = sand.u32 1, %s2720_s14   ;;  %p46_p7 = scmp.eq.s32.totalorder %s43_s24, 0 }
  0x1c   : > { %s1842_s26 = sshll.u32 %s198_s25, 9  ;;  %s2177_s28 = sshll.u32 %s2728_s16, 9 }
  0x1d   : > { %s2853_s29 = scalar_select %p46_p7, %s2720_s14, %s48_s11  }
  0x1e   : > { %s210_s5 = scalar_lea.hbm %s3146_s0, %s2177_s28  ;;  %s202_s7 = scalar_lea.vmem [#allocation3], %s1842_s26 }
  0x1f   : > { %s211_s6 = sshll.u32 %s210_s5, 4  ;;  %s213_s8 = sshll.u32 %s202_s7, 4  ;;  %s212_s6 = int_to_ptr.hbm [resolvable:$true] %s211_s6  ;;  %s214_s8 = int_to_ptr.vmem [resolvable:$true] %s213_s8 }
  0x20   : > { %p2486_p2 = pnand %p2495_p0, %p2838_p3  ;;  %s199_s21 = scalar_lea.sflag [#allocation4], %s198_s25 }
  0x21   : > { %s2738_s9 = smov 128   ;;  %s2739_s1 = smov 8  }
  0x22   : > { %2488 = dma.hbm_to_vmem [thread:$0]  (!%p2486_p2), %s212_s6, 8192, %s214_s8, %s199_s21, %s2738_s9, %s2738_s9, %s2739_s1  }
  0x23   : > { %225 = sbr.rel (%p2819_p8) target bundleno = 468 (0x1d4), region = 32  ;;  %s2865_s11 = sand.u32 (!%p2819_p8), 1, %s2716_s13  }
  0x24   : > { %s1847_s24 = sshll.u32 (!%p2819_p8), %s2865_s11, 9  ;;  %s228_s26 = scalar_lea.sflag (!%p2819_p8), [#allocation4], %s2865_s11 }
  0x25   : > { %s2869_s28 = scalar_lea.vmem (!%p2819_p8), [#allocation3], %s1847_s24 }
  0x28   : > { %2699 = dma.done.wait (%p2806_p4), %s228_s26, 8192  }
  0x29   : > { %2701 = vsyncadd (%p2806_p4), %s228_s26, 4294959104 }
  0x2a   : > { %2703 = dma.done.wait (%p2796_p1), [#allocation7], 2064  }
  0x2b   : > { %2705 = vsyncadd (%p2796_p1), [#allocation7], 4294965232  ;;  %v2249_v0 = vld [vmem:[#allocation6 + $0x38] sm:$0xff]  ;;  %v2248_v2 = vld [vmem:[#allocation6 + $0x30] sm:$0xff]  ;;  %s1850_s1 = sshll.u32 %s2865_s11, 8  ;;  %s2258_s22 = sshll.u32 %s2724_s15, 8 }
  0x2c   : > { %v2257_v1 = vld [vmem:[#allocation6 + $0x78] sm:$0xff]  ;;  %913 = vmatpush.bf16.msra.mxu0 %v2249_v0  ;;  %2450 = vmatpush.bf16.msra.mxu2 %v2249_v0  ;;  %v2256_v3 = vld [vmem:[#allocation6 + $0x70] sm:$0xff]  ;;  %v2247_v4 = vld [vmem:[#allocation6 + $0x28] sm:$0xff]  ;;  %s2965_s20 = scalar_lea.vmem [#allocation9], %s1850_s1  ;;  %s1719_s25 = scalar_lea.hbm %s3149_s3, %s2258_s22 }
  0x2d   : > { %1082 = vmatpush.bf16.msra.mxu1 %v2257_v1  ;;  %2458 = vmatpush.bf16.msra.mxu3 %v2257_v1  ;;  %v2255_v5 = vld [vmem:[#allocation6 + $0x68] sm:$0xff]  ;;  %v2246_v6 = vld [vmem:[#allocation6 + $0x20] sm:$0xff]  ;;  %v2245_v8 = vld [vmem:[#allocation6 + $0x18] sm:$0xff]  ;;  %s1720_s30 = sshll.u32 %s2965_s20, 4  ;;  %s1722_s15 = sshll.u32 %s1719_s25, 4  ;;  %s1721_s30 = int_to_ptr.vmem [resolvable:$true] %s1720_s30  ;;  %s1723_s15 = int_to_ptr.hbm [resolvable:$true] %s1722_s15 }
  0x2e   : > { %v2254_v7 = vld [vmem:[#allocation6 + $0x60] sm:$0xff]  ;;  %v2253_v9 = vld [vmem:[#allocation6 + $0x58] sm:$0xff]  ;;  %v2244_v10 = vld [vmem:[#allocation6 + $0x10] sm:$0xff]  ;;  %s1707_s4 = scalar_lea.sflag [#allocation5], %s2865_s11  ;;  %s2660_s5 = sshra.s32 %s1723_s15, 4  ;;  %s2661_s5 = int_to_ptr.hbm [resolvable:$true] %s2660_s5 }
  0x2f   : > { %v2252_v11 = vld [vmem:[#allocation6 + $0x50] sm:$0xff]  ;;  %v2243_v12 = vld [vmem:[#allocation6 + $0x8] sm:$0xff]  ;;  %v2242_v14 = vld [vmem:[#allocation6] sm:$0xff]  ;;  %s2662_s6 = scalar_lea.hbm %s2661_s5, 256  ;;  %s2666_s21 = scalar_lea.hbm %s3149_s3, 12544 }
  0x30   : > { %914 = vmatpush.bf16.msra.mxu0 %v2248_v2  ;;  %2451 = vmatpush.bf16.msra.mxu2 %v2248_v2  ;;  %v2251_v13 = vld [vmem:[#allocation6 + $0x48] sm:$0xff]  ;;  %v2250_v15 = vld [vmem:[#allocation6 + $0x40] sm:$0xff]  ;;  %v1861_v28 = vld [vmem:[%s2869_s28 + $0x10] sm:$0xf]  ;;  %p2663_p1 = scmp.ne.s32.totalorder %s2661_s5, %s2662_s6  ;;  %p2667_p9 = scmp.lt.s32.totalorder %s2661_s5, %s3149_s3 }
  0x31   : > { %1083 = vmatpush.bf16.msra.mxu1 %v2256_v3  ;;  %2459 = vmatpush.bf16.msra.mxu3 %v2256_v3  ;;  %v1853_v16 = vld [vmem:[%s2869_s28] sm:$0xf]  ;;  %v2179_v17 = vld [vmem:[%s2869_s28 + $0x4] sm:$0xf0]  ;;  %v2178_v20 = vld [vmem:[%s2869_s28 + $0x4] sm:$0xf]  ;;  %p2668_p10 = scmp.lt.s32.totalorder %s2666_s21, %s2662_s6 }
  0x32   : > { %v1981_v18 = vld [vmem:[%s2869_s28 + $0x100] sm:$0xf]  ;;  %v2211_v19 = vld [vmem:[%s2869_s28 + $0x104] sm:$0xf0]  ;;  %v1855_v21 = vld [vmem:[%s2869_s28 + $0x8] sm:$0xf0]  ;;  %v1854_v24 = vor.u32 %v2179_v17, %v1853_v16  ;;  %p2664_p4 = pnand %p2663_p1, %p2844_p5 }
  0x33   : > { %v2210_v22 = vld [vmem:[%s2869_s28 + $0x104] sm:$0xf]  ;;  %v1983_v23 = vld [vmem:[%s2869_s28 + $0x108] sm:$0xf0]  ;;  %v1982_v25 = vor.u32 %v2211_v19, %v1981_v18  ;;  %v1858_v26 = vor.u32 %v2178_v20, %v1855_v21  ;;  %v2181_v29 = vld [vmem:[%s2869_s28 + $0x14] sm:$0xf0]  ;;  %p2669_p11 = por %p2668_p10, %p2667_p9 }
  0x34   : > { %915 = vmatpush.bf16.msra.mxu0 %v2247_v4  ;;  %2452 = vmatpush.bf16.msra.mxu2 %v2247_v4  ;;  %v1986_v27 = vor.u32 %v2210_v22, %v1983_v23  ;;  %v1989_v30 = vld [vmem:[%s2869_s28 + $0x110] sm:$0xf]  ;;  %v2213_v31 = vld [vmem:[%s2869_s28 + $0x114] sm:$0xf0]  ;;  %v2180_v32 = vld [vmem:[%s2869_s28 + $0x14] sm:$0xf]  ;;  %v1862_v36 = vor.u32 %v2181_v29, %v1861_v28  ;;  %p2665_p8 = pneg %p2664_p4 }
  0x35   : > { %1084 = vmatpush.bf16.msra.mxu1 %v2255_v5  ;;  %2460 = vmatpush.bf16.msra.mxu3 %v2255_v5  ;;  %v1863_v33 = vld [vmem:[%s2869_s28 + $0x18] sm:$0xf0]  ;;  %v2212_v34 = vld [vmem:[%s2869_s28 + $0x114] sm:$0xf]  ;;  %v1990_v37 = vor.u32 %v2213_v31, %v1989_v30  ;;  %v1869_v40 = vld [vmem:[%s2869_s28 + $0x20] sm:$0xf] }
  0x36   : > { %v1991_v35 = vld [vmem:[%s2869_s28 + $0x118] sm:$0xf0]  ;;  %v1866_v38 = vor.u32 %v2180_v32, %v1863_v33  ;;  %v2183_v41 = vld [vmem:[%s2869_s28 + $0x24] sm:$0xf0]  ;;  %v1997_v42 = vld [vmem:[%s2869_s28 + $0x120] sm:$0xf]  ;;  %p2670_p12 = pnand %p2669_p11, %p2665_p8 }
  0x37   : > { %v1994_v39 = vor.u32 %v2212_v34, %v1991_v35  ;;  %v2215_v43 = vld [vmem:[%s2869_s28 + $0x124] sm:$0xf0]  ;;  %v2182_v44 = vld [vmem:[%s2869_s28 + $0x24] sm:$0xf]  ;;  %v1871_v45 = vld [vmem:[%s2869_s28 + $0x28] sm:$0xf0]  ;;  %v1870_v48 = vor.u32 %v2183_v41, %v1869_v40 }
  0x38   : > { %916 = vmatpush.bf16.msra.mxu0 %v2246_v6  ;;  %2453 = vmatpush.bf16.msra.mxu2 %v2246_v6  ;;  %v2214_v46 = vld [vmem:[%s2869_s28 + $0x124] sm:$0xf]  ;;  %v1999_v47 = vld [vmem:[%s2869_s28 + $0x128] sm:$0xf0]  ;;  %v1998_v49 = vor.u32 %v2215_v43, %v1997_v42  ;;  %v1874_v50 = vor.u32 %v2182_v44, %v1871_v45  ;;  %v1877_v52 = vld [vmem:[%s2869_s28 + $0x30] sm:$0xf] }
  0x39   : > { %1085 = vmatpush.bf16.msra.mxu1 %v2254_v7  ;;  %2461 = vmatpush.bf16.msra.mxu3 %v2254_v7  ;;  %v2002_v51 = vor.u32 %v2214_v46, %v1999_v47  ;;  %v2185_v53 = vld [vmem:[%s2869_s28 + $0x34] sm:$0xf0]  ;;  %v2005_v54 = vld [vmem:[%s2869_s28 + $0x130] sm:$0xf]  ;;  %v2184_v56 = vld [vmem:[%s2869_s28 + $0x34] sm:$0xf] }
  0x3a   : > { %v2217_v55 = vld [vmem:[%s2869_s28 + $0x134] sm:$0xf0]  ;;  %v1879_v57 = vld [vmem:[%s2869_s28 + $0x38] sm:$0xf0]  ;;  %v2216_v58 = vld [vmem:[%s2869_s28 + $0x134] sm:$0xf]  ;;  %v1878_v60 = vor.u32 %v2185_v53, %v1877_v52 }
  0x3b   : > { %v2007_v59 = vld [vmem:[%s2869_s28 + $0x138] sm:$0xf0]  ;;  %v2006_v61 = vor.u32 %v2217_v55, %v2005_v54  ;;  %v1882_v62 = vor.u32 %v2184_v56, %v1879_v57  ;;  %v1885_v0 = vld [vmem:[%s2869_s28 + $0x40] sm:$0xf]  ;;  %v2187_v1 = vld [vmem:[%s2869_s28 + $0x44] sm:$0xf0] }
  0x3c   : > { %917 = vmatpush.bf16.msra.mxu0 %v2245_v8  ;;  %2454 = vmatpush.bf16.msra.mxu2 %v2245_v8  ;;  %v2010_v63 = vor.u32 %v2216_v58, %v2007_v59  ;;  %v2013_v2 = vld [vmem:[%s2869_s28 + $0x140] sm:$0xf]  ;;  %v2219_v3 = vld [vmem:[%s2869_s28 + $0x144] sm:$0xf0]  ;;  %v2186_v4 = vld [vmem:[%s2869_s28 + $0x44] sm:$0xf]  ;;  %v1886_v8 = vor.u32 %v2187_v1, %v1885_v0 }
  0x3d   : > { %1086 = vmatpush.bf16.msra.mxu1 %v2253_v9  ;;  %2462 = vmatpush.bf16.msra.mxu3 %v2253_v9  ;;  %v1887_v5 = vld [vmem:[%s2869_s28 + $0x48] sm:$0xf0]  ;;  %v2218_v6 = vld [vmem:[%s2869_s28 + $0x144] sm:$0xf]  ;;  %v2014_v9 = vor.u32 %v2219_v3, %v2013_v2  ;;  %v2188_v16 = vld [vmem:[%s2869_s28 + $0x54] sm:$0xf] }
  0x3e   : > { %v2015_v7 = vld [vmem:[%s2869_s28 + $0x148] sm:$0xf0]  ;;  %v1895_v17 = vld [vmem:[%s2869_s28 + $0x58] sm:$0xf0]  ;;  %v2220_v18 = vld [vmem:[%s2869_s28 + $0x154] sm:$0xf] }
  0x3f   : > { %v2023_v19 = vld [vmem:[%s2869_s28 + $0x158] sm:$0xf0]  ;;  %v1898_v22 = vor.u32 %v2188_v16, %v1895_v17  ;;  %v2190_v28 = vld [vmem:[%s2869_s28 + $0x64] sm:$0xf]  ;;  %v1903_v29 = vld [vmem:[%s2869_s28 + $0x68] sm:$0xf0] }
  0x40   : > { %918 = vmatpush.bf16.msra.mxu0 %v2244_v10  ;;  %2455 = vmatpush.bf16.msra.mxu2 %v2244_v10  ;;  %v1890_v10 = vor.u32 %v2186_v4, %v1887_v5  ;;  %v2026_v23 = vor.u32 %v2220_v18, %v2023_v19  ;;  %v2222_v30 = vld [vmem:[%s2869_s28 + $0x164] sm:$0xf]  ;;  %v2031_v31 = vld [vmem:[%s2869_s28 + $0x168] sm:$0xf0]  ;;  %v1906_v34 = vor.u32 %v2190_v28, %v1903_v29  ;;  %v2192_v40 = vld [vmem:[%s2869_s28 + $0x74] sm:$0xf] }
  0x41   : > { %1087 = vmatpush.bf16.msra.mxu1 %v2252_v11  ;;  %2463 = vmatpush.bf16.msra.mxu3 %v2252_v11  ;;  %v2018_v11 = vor.u32 %v2218_v6, %v2015_v7  ;;  %v2034_v35 = vor.u32 %v2222_v30, %v2031_v31  ;;  %v1911_v41 = vld [vmem:[%s2869_s28 + $0x78] sm:$0xf0]  ;;  %v2224_v42 = vld [vmem:[%s2869_s28 + $0x174] sm:$0xf]  ;;  %v2194_v52 = vld [vmem:[%s2869_s28 + $0x84] sm:$0xf] }
  0x42   : > { %v2039_v43 = vld [vmem:[%s2869_s28 + $0x178] sm:$0xf0]  ;;  %v1914_v46 = vor.u32 %v2192_v40, %v1911_v41  ;;  %v1919_v53 = vld [vmem:[%s2869_s28 + $0x88] sm:$0xf0]  ;;  %v2226_v54 = vld [vmem:[%s2869_s28 + $0x184] sm:$0xf] }
  0x43   : > { %v2042_v47 = vor.u32 %v2224_v42, %v2039_v43  ;;  %v2047_v55 = vld [vmem:[%s2869_s28 + $0x188] sm:$0xf0]  ;;  %v1922_v59 = vor.u32 %v2194_v52, %v1919_v53  ;;  %v1925_v6 = vld [vmem:[%s2869_s28 + $0x90] sm:$0xf]  ;;  %v2197_v7 = vld [vmem:[%s2869_s28 + $0x94] sm:$0xf0] }
  0x44   : > { %919 = vmatpush.bf16.msra.mxu0 %v2243_v12  ;;  %2456 = vmatpush.bf16.msra.mxu2 %v2243_v12  ;;  %v1893_v12 = vld [vmem:[%s2869_s28 + $0x50] sm:$0xf]  ;;  %v1933_v40 = vld [vmem:[%s2869_s28 + $0xa0] sm:$0xf]  ;;  %v2199_v41 = vld [vmem:[%s2869_s28 + $0xa4] sm:$0xf0] }
  0x45   : > { %1088 = vmatpush.bf16.msra.mxu1 %v2251_v13  ;;  %2464 = vmatpush.bf16.msra.mxu3 %v2251_v13  ;;  %v2189_v13 = vld [vmem:[%s2869_s28 + $0x54] sm:$0xf0]  ;;  %v2061_v42 = vld [vmem:[%s2869_s28 + $0x1a0] sm:$0xf] }
  0x46   : > { %v1894_v20 = vor.u32 %v2189_v13, %v1893_v12  ;;  %v2196_v12 = vld [vmem:[%s2869_s28 + $0x94] sm:$0xf]  ;;  %v1927_v13 = vld [vmem:[%s2869_s28 + $0x98] sm:$0xf0] }
  0x48   : > { %920 = vmatpush.bf16.msra.mxu0 %v2242_v14  ;;  %2457 = vmatpush.bf16.msra.mxu2 %v2242_v14  ;;  %v2021_v14 = vld [vmem:[%s2869_s28 + $0x150] sm:$0xf] }
  0x49   : > { %1089 = vmatpush.bf16.msra.mxu1 %v2250_v15  ;;  %2465 = vmatpush.bf16.msra.mxu3 %v2250_v15  ;;  %v2221_v15 = vld [vmem:[%s2869_s28 + $0x154] sm:$0xf0] }
  0x4a   : > { %v2022_v21 = vor.u32 %v2221_v15, %v2021_v14  ;;  %v2228_v14 = vld [vmem:[%s2869_s28 + $0x194] sm:$0xf]  ;;  %v2055_v15 = vld [vmem:[%s2869_s28 + $0x198] sm:$0xf0] }
  0x4b   : > { %921 = vmatmul.bf16.vlgmr.msra.gmra.mxu0 %v1854_v24  ;;  %1001 = vmatmul.bf16.vlgmr.msra.gmra.mxu2 %v1982_v25  ;;  %v1901_v24 = vld [vmem:[%s2869_s28 + $0x60] sm:$0xf]  ;;  %v2191_v25 = vld [vmem:[%s2869_s28 + $0x64] sm:$0xf0] }
  0x4c   : > { %1090 = vmatmul.bf16.vlgmr.msra.gmra.mxu1 %v1858_v26  ;;  %1170 = vmatmul.bf16.vlgmr.msra.gmra.mxu3 %v1986_v27  ;;  %v2029_v26 = vld [vmem:[%s2869_s28 + $0x160] sm:$0xf]  ;;  %v2223_v27 = vld [vmem:[%s2869_s28 + $0x164] sm:$0xf0]  ;;  %v1902_v32 = vor.u32 %v2191_v25, %v1901_v24 }
  0x4d   : > { %v2030_v33 = vor.u32 %v2223_v27, %v2029_v26  ;;  %v2058_v27 = vor.u32 %v2228_v14, %v2055_v15 }
  0x5b   : > { %926 = vmatmul.bf16.gmra.mxu0 %v1862_v36  ;;  %1006 = vmatmul.bf16.gmra.mxu2 %v1990_v37  ;;  %v1909_v36 = vld [vmem:[%s2869_s28 + $0x70] sm:$0xf]  ;;  %v2193_v37 = vld [vmem:[%s2869_s28 + $0x74] sm:$0xf0] }
  0x5c   : > { %1095 = vmatmul.bf16.gmra.mxu1 %v1866_v38  ;;  %1175 = vmatmul.bf16.gmra.mxu3 %v1994_v39  ;;  %v2037_v38 = vld [vmem:[%s2869_s28 + $0x170] sm:$0xf]  ;;  %v2225_v39 = vld [vmem:[%s2869_s28 + $0x174] sm:$0xf0]  ;;  %v1910_v44 = vor.u32 %v2193_v37, %v1909_v36 }
  0x5d   : > { %v2038_v45 = vor.u32 %v2225_v39, %v2037_v38 }
  0x6b   : > { %931 = vmatmul.bf16.gmra.mxu0 %v1870_v48  ;;  %1011 = vmatmul.bf16.gmra.mxu2 %v1998_v49  ;;  %v1917_v48 = vld [vmem:[%s2869_s28 + $0x80] sm:$0xf]  ;;  %v2195_v49 = vld [vmem:[%s2869_s28 + $0x84] sm:$0xf0] }
  0x6c   : > { %1100 = vmatmul.bf16.gmra.mxu1 %v1874_v50  ;;  %1180 = vmatmul.bf16.gmra.mxu3 %v2002_v51  ;;  %v2045_v50 = vld [vmem:[%s2869_s28 + $0x180] sm:$0xf]  ;;  %v2227_v51 = vld [vmem:[%s2869_s28 + $0x184] sm:$0xf0]  ;;  %v1918_v56 = vor.u32 %v2195_v49, %v1917_v48  ;;  %v2230_v48 = vld [vmem:[%s2869_s28 + $0x1a4] sm:$0xf] }
  0x6d   : > { %v2046_v57 = vor.u32 %v2227_v51, %v2045_v50  ;;  %v2063_v49 = vld [vmem:[%s2869_s28 + $0x1a8] sm:$0xf0] }
  0x7b   : > { %936 = vmatmul.bf16.gmra.mxu0 %v1878_v60  ;;  %1016 = vmatmul.bf16.gmra.mxu2 %v2006_v61  ;;  %v2050_v60 = vor.u32 %v2226_v54, %v2047_v55  ;;  %v1934_v54 = vor.u32 %v2199_v41, %v1933_v40 }
  0x7c   : > { %1105 = vmatmul.bf16.gmra.mxu1 %v1882_v62  ;;  %1185 = vmatmul.bf16.gmra.mxu3 %v2010_v63  ;;  %v2951_v63 = vld [vmem:[#allocation8] ss:$0 sm:$0xff] }
  0x8b   : > { %941 = vmatmul.bf16.gmra.mxu0 %v1886_v8  ;;  %1021 = vmatmul.bf16.gmra.mxu2 %v2014_v9  ;;  %v2053_v8 = vld [vmem:[%s2869_s28 + $0x190] sm:$0xf] }
  0x8c   : > { %1110 = vmatmul.bf16.gmra.mxu1 %v1890_v10  ;;  %1190 = vmatmul.bf16.gmra.mxu3 %v2018_v11  ;;  %v2229_v11 = vld [vmem:[%s2869_s28 + $0x194] sm:$0xf0] }
  0x9b   : > { %946 = vmatmul.bf16.gmra.mxu0 %v1894_v20  ;;  %1026 = vmatmul.bf16.gmra.mxu2 %v2022_v21  ;;  %v1926_v20 = vor.u32 %v2197_v7, %v1925_v6  ;;  %v2054_v21 = vor.u32 %v2229_v11, %v2053_v8  ;;  %v1941_v11 = vld [vmem:[%s2869_s28 + $0xb0] sm:$0xf] }
  0x9c   : > { %1115 = vmatmul.bf16.gmra.mxu1 %v1898_v22  ;;  %1195 = vmatmul.bf16.gmra.mxu3 %v2026_v23  ;;  %v1930_v22 = vor.u32 %v2196_v12, %v1927_v13  ;;  %v2201_v12 = vld [vmem:[%s2869_s28 + $0xb4] sm:$0xf0]  ;;  %v2069_v13 = vld [vmem:[%s2869_s28 + $0x1b0] sm:$0xf] }
  0xab   : > { %951 = vmatmul.bf16.gmra.mxu0 %v1902_v32  ;;  %1031 = vmatmul.bf16.gmra.mxu2 %v2030_v33 }
  0xac   : > { %1120 = vmatmul.bf16.gmra.mxu1 %v1906_v34  ;;  %1200 = vmatmul.bf16.gmra.mxu3 %v2034_v35 }
  0xbb   : > { %956 = vmatmul.bf16.gmra.mxu0 %v1910_v44  ;;  %1036 = vmatmul.bf16.gmra.mxu2 %v2038_v45  ;;  %v2231_v45 = vld [vmem:[%s2869_s28 + $0x1a4] sm:$0xf0] }
  0xbc   : > { %1125 = vmatmul.bf16.gmra.mxu1 %v1914_v46  ;;  %1205 = vmatmul.bf16.gmra.mxu3 %v2042_v47  ;;  %v2198_v46 = vld [vmem:[%s2869_s28 + $0xa4] sm:$0xf]  ;;  %v1935_v47 = vld [vmem:[%s2869_s28 + $0xa8] sm:$0xf0]  ;;  %v2062_v55 = vor.u32 %v2231_v45, %v2061_v42  ;;  %v1949_v45 = vld [vmem:[%s2869_s28 + $0xc0] sm:$0xf] }
  0xc8   : > { %v922_v58 = vpop.f32.mrf.mxu0 }
  0xc9   : > { %v1091_v61 = vpop.f32.mrf.mxu1 }
  0xca   : > { %v1092_v62 = vadd.f32 %v1091_v61, %v922_v58  ;;  %v2066_v61 = vor.u32 %v2230_v48, %v2063_v49 }
  0xcb   : > { %961 = vmatmul.bf16.gmra.mxu0 %v1918_v56  ;;  %1041 = vmatmul.bf16.gmra.mxu2 %v2046_v57  ;;  %v1938_v56 = vor.u32 %v2198_v46, %v1935_v47  ;;  %v2203_v46 = vld [vmem:[%s2869_s28 + $0xc4] sm:$0xf0]  ;;  %v2077_v47 = vld [vmem:[%s2869_s28 + $0x1c0] sm:$0xf] }
  0xcc   : > { %1130 = vmatmul.bf16.gmra.mxu1 %v1922_v59  ;;  %1210 = vmatmul.bf16.gmra.mxu3 %v2050_v60  ;;  %v1450_v4 = vadd.f32 %v2951_v63, %v1092_v62 }
  0xce   : > { %v1002_v0 = vpop.f32.mrf.mxu2  ;;  %v1514_v16 = vmax.f32 %v1450_v4, 0.0 }
  0xcf   : > { %v1171_v1 = vpop.f32.mrf.mxu3 }
  0xd0   : > { %v924_v2 = vpop.f32.mrf.mxu0  ;;  %v1172_v9 = vadd.f32 %v1171_v1, %v1002_v0 }
  0xd1   : > { %v1093_v3 = vpop.f32.mrf.mxu1 }
  0xd2   : > { %v1094_v5 = vadd.f32 %v1093_v3, %v924_v2  ;;  %v1482_v23 = vadd.f32 %v2951_v63, %v1172_v9 }
  0xd4   : > { %v1451_v10 = vadd.f32 %v2951_v63, %v1094_v5  ;;  %v1546_v30 = vmax.f32 %v1482_v23, 0.0 }
  0xd6   : > { %v1515_v17 = vmax.f32 %v1451_v10, 0.0  ;;  %v1004_v18 = vpop.f32.mrf.mxu2 }
  0xd7   : > { %v1173_v19 = vpop.f32.mrf.mxu3 }
  0xd8   : > { %v2262_v24 = vpack.c.bf16 %v1515_v17, %v1514_v16  ;;  %v1174_v25 = vadd.f32 %v1173_v19, %v1004_v18  ;;  %v927_v26 = vpop.f32.mrf.mxu0  ;;  %v2233_v16 = vld [vmem:[%s2869_s28 + $0x1b4] sm:$0xf0]  ;;  %v2200_v17 = vld [vmem:[%s2869_s28 + $0xb4] sm:$0xf]  ;;  %v1943_v18 = vld [vmem:[%s2869_s28 + $0xb8] sm:$0xf0] }
  0xd9   : > { %v1096_v28 = vpop.f32.mrf.mxu1  ;;  %v2232_v19 = vld [vmem:[%s2869_s28 + $0x1b4] sm:$0xf] }
  0xda   : > { %2263 = vst [vmem:[%s2965_s20] sm:$0xff] %v2262_v24   ;;  %v1483_v29 = vadd.f32 %v2951_v63, %v1174_v25  ;;  %v1097_v33 = vadd.f32 %v1096_v28, %v927_v26  ;;  %v1942_v25 = vor.u32 %v2201_v12, %v1941_v11  ;;  %v2070_v26 = vor.u32 %v2233_v16, %v2069_v13  ;;  %v1957_v16 = vld [vmem:[%s2869_s28 + $0xd0] sm:$0xf] }
  0xdb   : > { %966 = vmatmul.bf16.gmra.mxu0 %v1926_v20  ;;  %1046 = vmatmul.bf16.gmra.mxu2 %v2054_v21  ;;  %v2071_v20 = vld [vmem:[%s2869_s28 + $0x1b8] sm:$0xf0] }
  0xdc   : > { %v1547_v31 = vmax.f32 %v1483_v29, 0.0  ;;  %1135 = vmatmul.bf16.gmra.mxu1 %v1930_v22  ;;  %1215 = vmatmul.bf16.gmra.mxu3 %v2058_v27  ;;  %v1452_v38 = vadd.f32 %v2951_v63, %v1097_v33  ;;  %v1946_v27 = vor.u32 %v2200_v17, %v1943_v18  ;;  %v2205_v17 = vld [vmem:[%s2869_s28 + $0xd4] sm:$0xf0]  ;;  %v2085_v18 = vld [vmem:[%s2869_s28 + $0x1d0] sm:$0xf] }
  0xde   : > { %v2342_v32 = vpack.c.bf16 %v1547_v31, %v1546_v30  ;;  %v1007_v34 = vpop.f32.mrf.mxu2  ;;  %v1516_v50 = vmax.f32 %v1452_v38, 0.0 }
  0xdf   : > { %v1176_v35 = vpop.f32.mrf.mxu3 }
  0xe0   : > { %2434 = vst [vmem:[%s2965_s20 + $0x80] sm:$0xff] %v2342_v32   ;;  %v929_v36 = vpop.f32.mrf.mxu0  ;;  %v1177_v43 = vadd.f32 %v1176_v35, %v1007_v34  ;;  %v2074_v32 = vor.u32 %v2232_v19, %v2071_v20 }
  0xe1   : > { %v1098_v37 = vpop.f32.mrf.mxu1 }
  0xe2   : > { %v1099_v39 = vadd.f32 %v1098_v37, %v929_v36  ;;  %v1484_v57 = vadd.f32 %v2951_v63, %v1177_v43 }
  0xe4   : > { %v1453_v44 = vadd.f32 %v2951_v63, %v1099_v39  ;;  %v1548_v1 = vmax.f32 %v1484_v57, 0.0 }
  0xe6   : > { %v1517_v51 = vmax.f32 %v1453_v44, 0.0  ;;  %v1009_v52 = vpop.f32.mrf.mxu2 }
  0xe7   : > { %v1178_v53 = vpop.f32.mrf.mxu3 }
  0xe8   : > { %v2267_v58 = vpack.c.bf16 %v1517_v51, %v1516_v50  ;;  %v1179_v59 = vadd.f32 %v1178_v53, %v1009_v52  ;;  %v932_v60 = vpop.f32.mrf.mxu0  ;;  %v2235_v50 = vld [vmem:[%s2869_s28 + $0x1c4] sm:$0xf0]  ;;  %v2202_v51 = vld [vmem:[%s2869_s28 + $0xc4] sm:$0xf]  ;;  %v1951_v52 = vld [vmem:[%s2869_s28 + $0xc8] sm:$0xf0] }
  0xe9   : > { %v1101_v62 = vpop.f32.mrf.mxu1  ;;  %v2234_v53 = vld [vmem:[%s2869_s28 + $0x1c4] sm:$0xf] }
  0xea   : > { %2419 = vst [vmem:[%s2965_s20 + $0x8] sm:$0xff] %v2267_v58   ;;  %v1485_v0 = vadd.f32 %v2951_v63, %v1179_v59  ;;  %v1102_v4 = vadd.f32 %v1101_v62, %v932_v60  ;;  %v1950_v59 = vor.u32 %v2203_v46, %v1949_v45  ;;  %v2078_v60 = vor.u32 %v2235_v50, %v2077_v47  ;;  %v1965_v50 = vld [vmem:[%s2869_s28 + $0xe0] sm:$0xf] }
  0xeb   : > { %971 = vmatmul.bf16.gmra.mxu0 %v1934_v54  ;;  %1051 = vmatmul.bf16.gmra.mxu2 %v2062_v55  ;;  %v2079_v54 = vld [vmem:[%s2869_s28 + $0x1c8] sm:$0xf0] }
  0xec   : > { %v1549_v2 = vmax.f32 %v1485_v0, 0.0  ;;  %1140 = vmatmul.bf16.gmra.mxu1 %v1938_v56  ;;  %1220 = vmatmul.bf16.gmra.mxu3 %v2066_v61  ;;  %v1454_v9 = vadd.f32 %v2951_v63, %v1102_v4  ;;  %v1954_v61 = vor.u32 %v2202_v51, %v1951_v52  ;;  %v2207_v51 = vld [vmem:[%s2869_s28 + $0xe4] sm:$0xf0]  ;;  %v2093_v52 = vld [vmem:[%s2869_s28 + $0x1e0] sm:$0xf] }
  0xee   : > { %v2347_v3 = vpack.c.bf16 %v1549_v2, %v1548_v1  ;;  %v1012_v5 = vpop.f32.mrf.mxu2  ;;  %v1518_v21 = vmax.f32 %v1454_v9, 0.0 }
  0xef   : > { %v1181_v6 = vpop.f32.mrf.mxu3 }
  0xf0   : > { %2435 = vst [vmem:[%s2965_s20 + $0x88] sm:$0xff] %v2347_v3   ;;  %v934_v7 = vpop.f32.mrf.mxu0  ;;  %v1182_v14 = vadd.f32 %v1181_v6, %v1012_v5  ;;  %v2082_v3 = vor.u32 %v2234_v53, %v2079_v54 }
  0xf1   : > { %v1103_v8 = vpop.f32.mrf.mxu1 }
  0xf2   : > { %v1104_v10 = vadd.f32 %v1103_v8, %v934_v7  ;;  %v1486_v28 = vadd.f32 %v2951_v63, %v1182_v14 }
  0xf4   : > { %v1455_v15 = vadd.f32 %v2951_v63, %v1104_v10  ;;  %v1550_v35 = vmax.f32 %v1486_v28, 0.0 }
  0xf6   : > { %v1519_v22 = vmax.f32 %v1455_v15, 0.0  ;;  %v1014_v23 = vpop.f32.mrf.mxu2 }
  0xf7   : > { %v1183_v24 = vpop.f32.mrf.mxu3 }
  0xf8   : > { %v2272_v29 = vpack.c.bf16 %v1519_v22, %v1518_v21  ;;  %v1184_v30 = vadd.f32 %v1183_v24, %v1014_v23  ;;  %v937_v31 = vpop.f32.mrf.mxu0  ;;  %v2237_v21 = vld [vmem:[%s2869_s28 + $0x1d4] sm:$0xf0]  ;;  %v2204_v22 = vld [vmem:[%s2869_s28 + $0xd4] sm:$0xf]  ;;  %v1959_v23 = vld [vmem:[%s2869_s28 + $0xd8] sm:$0xf0] }
  0xf9   : > { %v1106_v33 = vpop.f32.mrf.mxu1  ;;  %v2236_v24 = vld [vmem:[%s2869_s28 + $0x1d4] sm:$0xf] }
  0xfa   : > { %2420 = vst [vmem:[%s2965_s20 + $0x10] sm:$0xff] %v2272_v29   ;;  %v1487_v34 = vadd.f32 %v2951_v63, %v1184_v30  ;;  %v1107_v38 = vadd.f32 %v1106_v33, %v937_v31  ;;  %v1958_v30 = vor.u32 %v2205_v17, %v1957_v16  ;;  %v2086_v31 = vor.u32 %v2237_v21, %v2085_v18  ;;  %v1973_v21 = vld [vmem:[%s2869_s28 + $0xf0] sm:$0xf] }
  0xfb   : > { %976 = vmatmul.bf16.gmra.mxu0 %v1942_v25  ;;  %1056 = vmatmul.bf16.gmra.mxu2 %v2070_v26  ;;  %v2087_v25 = vld [vmem:[%s2869_s28 + $0x1d8] sm:$0xf0] }
  0xfc   : > { %v1551_v36 = vmax.f32 %v1487_v34, 0.0  ;;  %1145 = vmatmul.bf16.gmra.mxu1 %v1946_v27  ;;  %1225 = vmatmul.bf16.gmra.mxu3 %v2074_v32  ;;  %v1456_v43 = vadd.f32 %v2951_v63, %v1107_v38  ;;  %v1962_v32 = vor.u32 %v2204_v22, %v1959_v23  ;;  %v2209_v22 = vld [vmem:[%s2869_s28 + $0xf4] sm:$0xf0]  ;;  %v2101_v23 = vld [vmem:[%s2869_s28 + $0x1f0] sm:$0xf] }
  0xfe   : > { %v2352_v37 = vpack.c.bf16 %v1551_v36, %v1550_v35  ;;  %v1017_v39 = vpop.f32.mrf.mxu2  ;;  %v1520_v55 = vmax.f32 %v1456_v43, 0.0 }
  0xff   : > { %v1186_v40 = vpop.f32.mrf.mxu3 }
 0x100   : > { %2436 = vst [vmem:[%s2965_s20 + $0x90] sm:$0xff] %v2352_v37   ;;  %v939_v41 = vpop.f32.mrf.mxu0  ;;  %v1187_v48 = vadd.f32 %v1186_v40, %v1017_v39  ;;  %v2090_v37 = vor.u32 %v2236_v24, %v2087_v25 }
 0x101   : > { %v1108_v42 = vpop.f32.mrf.mxu1 }
 0x102   : > { %v1109_v44 = vadd.f32 %v1108_v42, %v939_v41  ;;  %v1488_v62 = vadd.f32 %v2951_v63, %v1187_v48 }
 0x104   : > { %v1457_v49 = vadd.f32 %v2951_v63, %v1109_v44  ;;  %v1552_v6 = vmax.f32 %v1488_v62, 0.0 }
 0x106   : > { %v1521_v56 = vmax.f32 %v1457_v49, 0.0  ;;  %v1019_v57 = vpop.f32.mrf.mxu2 }
 0x107   : > { %v1188_v58 = vpop.f32.mrf.mxu3 }
 0x108   : > { %v2277_v0 = vpack.c.bf16 %v1521_v56, %v1520_v55  ;;  %v1189_v1 = vadd.f32 %v1188_v58, %v1019_v57  ;;  %v942_v2 = vpop.f32.mrf.mxu0  ;;  %v2239_v55 = vld [vmem:[%s2869_s28 + $0x1e4] sm:$0xf0]  ;;  %v2206_v56 = vld [vmem:[%s2869_s28 + $0xe4] sm:$0xf]  ;;  %v1967_v57 = vld [vmem:[%s2869_s28 + $0xe8] sm:$0xf0] }
 0x109   : > { %v1111_v4 = vpop.f32.mrf.mxu1  ;;  %v2238_v58 = vld [vmem:[%s2869_s28 + $0x1e4] sm:$0xf] }
 0x10a   : > { %2421 = vst [vmem:[%s2965_s20 + $0x18] sm:$0xff] %v2277_v0   ;;  %v1489_v5 = vadd.f32 %v2951_v63, %v1189_v1  ;;  %v1112_v9 = vadd.f32 %v1111_v4, %v942_v2  ;;  %v1966_v1 = vor.u32 %v2207_v51, %v1965_v50  ;;  %v2094_v2 = vor.u32 %v2239_v55, %v2093_v52 }
 0x10b   : > { %981 = vmatmul.bf16.gmra.mxu0 %v1950_v59  ;;  %1061 = vmatmul.bf16.gmra.mxu2 %v2078_v60  ;;  %v2095_v59 = vld [vmem:[%s2869_s28 + $0x1e8] sm:$0xf0] }
 0x10c   : > { %v1553_v7 = vmax.f32 %v1489_v5, 0.0  ;;  %1150 = vmatmul.bf16.gmra.mxu1 %v1954_v61  ;;  %1230 = vmatmul.bf16.gmra.mxu3 %v2082_v3  ;;  %v1458_v14 = vadd.f32 %v2951_v63, %v1112_v9  ;;  %v1970_v3 = vor.u32 %v2206_v56, %v1967_v57 }
 0x10e   : > { %v2357_v8 = vpack.c.bf16 %v1553_v7, %v1552_v6  ;;  %v1022_v10 = vpop.f32.mrf.mxu2  ;;  %v1522_v26 = vmax.f32 %v1458_v14, 0.0 }
 0x10f   : > { %v1191_v11 = vpop.f32.mrf.mxu3 }
 0x110   : > { %2437 = vst [vmem:[%s2965_s20 + $0x98] sm:$0xff] %v2357_v8   ;;  %v944_v12 = vpop.f32.mrf.mxu0  ;;  %v1192_v19 = vadd.f32 %v1191_v11, %v1022_v10  ;;  %v2098_v8 = vor.u32 %v2238_v58, %v2095_v59 }
 0x111   : > { %v1113_v13 = vpop.f32.mrf.mxu1 }
 0x112   : > { %v1114_v15 = vadd.f32 %v1113_v13, %v944_v12  ;;  %v1490_v33 = vadd.f32 %v2951_v63, %v1192_v19 }
 0x114   : > { %v1459_v20 = vadd.f32 %v2951_v63, %v1114_v15  ;;  %v1554_v40 = vmax.f32 %v1490_v33, 0.0 }
 0x116   : > { %v1523_v27 = vmax.f32 %v1459_v20, 0.0  ;;  %v1024_v28 = vpop.f32.mrf.mxu2 }
 0x117   : > { %v1193_v29 = vpop.f32.mrf.mxu3 }
 0x118   : > { %v2282_v34 = vpack.c.bf16 %v1523_v27, %v1522_v26  ;;  %v1194_v35 = vadd.f32 %v1193_v29, %v1024_v28  ;;  %v947_v36 = vpop.f32.mrf.mxu0  ;;  %v2241_v26 = vld [vmem:[%s2869_s28 + $0x1f4] sm:$0xf0]  ;;  %v2208_v27 = vld [vmem:[%s2869_s28 + $0xf4] sm:$0xf]  ;;  %v1975_v28 = vld [vmem:[%s2869_s28 + $0xf8] sm:$0xf0] }
 0x119   : > { %v1116_v38 = vpop.f32.mrf.mxu1  ;;  %v2240_v29 = vld [vmem:[%s2869_s28 + $0x1f4] sm:$0xf] }
 0x11a   : > { %2422 = vst [vmem:[%s2965_s20 + $0x20] sm:$0xff] %v2282_v34   ;;  %v1491_v39 = vadd.f32 %v2951_v63, %v1194_v35  ;;  %v1117_v43 = vadd.f32 %v1116_v38, %v947_v36  ;;  %v1974_v35 = vor.u32 %v2209_v22, %v1973_v21  ;;  %v2102_v36 = vor.u32 %v2241_v26, %v2101_v23 }
 0x11b   : > { %986 = vmatmul.bf16.gmra.mxu0 %v1958_v30  ;;  %1066 = vmatmul.bf16.gmra.mxu2 %v2086_v31  ;;  %v2103_v30 = vld [vmem:[%s2869_s28 + $0x1f8] sm:$0xf0] }
 0x11c   : > { %v1555_v41 = vmax.f32 %v1491_v39, 0.0  ;;  %1155 = vmatmul.bf16.gmra.mxu1 %v1962_v32  ;;  %1235 = vmatmul.bf16.gmra.mxu3 %v2090_v37  ;;  %v1460_v48 = vadd.f32 %v2951_v63, %v1117_v43  ;;  %v1978_v37 = vor.u32 %v2208_v27, %v1975_v28 }
 0x11e   : > { %v2362_v42 = vpack.c.bf16 %v1555_v41, %v1554_v40  ;;  %v1027_v44 = vpop.f32.mrf.mxu2  ;;  %v1524_v60 = vmax.f32 %v1460_v48, 0.0 }
 0x11f   : > { %v1196_v45 = vpop.f32.mrf.mxu3 }
 0x120   : > { %2438 = vst [vmem:[%s2965_s20 + $0xa0] sm:$0xff] %v2362_v42   ;;  %v949_v46 = vpop.f32.mrf.mxu0  ;;  %v1197_v53 = vadd.f32 %v1196_v45, %v1027_v44  ;;  %v2106_v42 = vor.u32 %v2240_v29, %v2103_v30 }
 0x121   : > { %v1118_v47 = vpop.f32.mrf.mxu1 }
 0x122   : > { %v1119_v49 = vadd.f32 %v1118_v47, %v949_v46  ;;  %v1492_v4 = vadd.f32 %v2951_v63, %v1197_v53 }
 0x124   : > { %v1461_v54 = vadd.f32 %v2951_v63, %v1119_v49  ;;  %v1556_v11 = vmax.f32 %v1492_v4, 0.0 }
 0x126   : > { %v1525_v61 = vmax.f32 %v1461_v54, 0.0  ;;  %v1029_v62 = vpop.f32.mrf.mxu2 }
 0x127   : > { %v1198_v0 = vpop.f32.mrf.mxu3 }
 0x128   : > { %v2287_v5 = vpack.c.bf16 %v1525_v61, %v1524_v60  ;;  %v1199_v6 = vadd.f32 %v1198_v0, %v1029_v62  ;;  %v952_v7 = vpop.f32.mrf.mxu0 }
 0x129   : > { %v1121_v9 = vpop.f32.mrf.mxu1 }
 0x12a   : > { %2423 = vst [vmem:[%s2965_s20 + $0x28] sm:$0xff] %v2287_v5   ;;  %v1493_v10 = vadd.f32 %v2951_v63, %v1199_v6  ;;  %v1122_v14 = vadd.f32 %v1121_v9, %v952_v7 }
 0x12b   : > { %991 = vmatmul.bf16.gmra.mxu0 %v1966_v1  ;;  %1071 = vmatmul.bf16.gmra.mxu2 %v2094_v2 }
 0x12c   : > { %v1557_v12 = vmax.f32 %v1493_v10, 0.0  ;;  %1160 = vmatmul.bf16.gmra.mxu1 %v1970_v3  ;;  %1240 = vmatmul.bf16.gmra.mxu3 %v2098_v8  ;;  %v1462_v19 = vadd.f32 %v2951_v63, %v1122_v14 }
 0x12e   : > { %v2367_v13 = vpack.c.bf16 %v1557_v12, %v1556_v11  ;;  %v1032_v15 = vpop.f32.mrf.mxu2  ;;  %v1526_v31 = vmax.f32 %v1462_v19, 0.0 }
 0x12f   : > { %v1201_v16 = vpop.f32.mrf.mxu3 }
 0x130   : > { %2439 = vst [vmem:[%s2965_s20 + $0xa8] sm:$0xff] %v2367_v13   ;;  %v954_v17 = vpop.f32.mrf.mxu0  ;;  %v1202_v24 = vadd.f32 %v1201_v16, %v1032_v15 }
 0x131   : > { %v1123_v18 = vpop.f32.mrf.mxu1 }
 0x132   : > { %v1124_v20 = vadd.f32 %v1123_v18, %v954_v17  ;;  %v1494_v38 = vadd.f32 %v2951_v63, %v1202_v24 }
 0x134   : > { %v1463_v25 = vadd.f32 %v2951_v63, %v1124_v20  ;;  %v1558_v45 = vmax.f32 %v1494_v38, 0.0 }
 0x136   : > { %v1527_v32 = vmax.f32 %v1463_v25, 0.0  ;;  %v1034_v33 = vpop.f32.mrf.mxu2 }
 0x137   : > { %v1203_v34 = vpop.f32.mrf.mxu3 }
 0x138   : > { %v2292_v39 = vpack.c.bf16 %v1527_v32, %v1526_v31  ;;  %v1204_v40 = vadd.f32 %v1203_v34, %v1034_v33  ;;  %v957_v41 = vpop.f32.mrf.mxu0 }
 0x139   : > { %v1126_v43 = vpop.f32.mrf.mxu1 }
 0x13a   : > { %2424 = vst [vmem:[%s2965_s20 + $0x30] sm:$0xff] %v2292_v39   ;;  %v1495_v44 = vadd.f32 %v2951_v63, %v1204_v40  ;;  %v1127_v48 = vadd.f32 %v1126_v43, %v957_v41 }
 0x13b   : > { %996 = vmatmul.bf16.gmra.mxu0 %v1974_v35  ;;  %1076 = vmatmul.bf16.gmra.mxu2 %v2102_v36 }
 0x13c   : > { %v1559_v46 = vmax.f32 %v1495_v44, 0.0  ;;  %1165 = vmatmul.bf16.gmra.mxu1 %v1978_v37  ;;  %1245 = vmatmul.bf16.gmra.mxu3 %v2106_v42  ;;  %v1464_v53 = vadd.f32 %v2951_v63, %v1127_v48 }
 0x13e   : > { %v2372_v47 = vpack.c.bf16 %v1559_v46, %v1558_v45  ;;  %v1037_v49 = vpop.f32.mrf.mxu2  ;;  %v1528_v57 = vmax.f32 %v1464_v53, 0.0 }
 0x13f   : > { %v1206_v50 = vpop.f32.mrf.mxu3 }
 0x140   : > { %2440 = vst [vmem:[%s2965_s20 + $0xb0] sm:$0xff] %v2372_v47   ;;  %v959_v51 = vpop.f32.mrf.mxu0  ;;  %v1207_v55 = vadd.f32 %v1206_v50, %v1037_v49 }
 0x141   : > { %v1128_v52 = vpop.f32.mrf.mxu1 }
 0x142   : > { %v1129_v54 = vadd.f32 %v1128_v52, %v959_v51  ;;  %v1496_v61 = vadd.f32 %v2951_v63, %v1207_v55 }
 0x144   : > { %v1465_v56 = vadd.f32 %v2951_v63, %v1129_v54  ;;  %v1560_v4 = vmax.f32 %v1496_v61, 0.0 }
 0x146   : > { %v1529_v58 = vmax.f32 %v1465_v56, 0.0  ;;  %v1039_v59 = vpop.f32.mrf.mxu2 }
 0x147   : > { %v1208_v60 = vpop.f32.mrf.mxu3 }
 0x148   : > { %v2297_v62 = vpack.c.bf16 %v1529_v58, %v1528_v57  ;;  %v1209_v0 = vadd.f32 %v1208_v60, %v1039_v59  ;;  %v962_v1 = vpop.f32.mrf.mxu0 }
 0x149   : > { %v1131_v2 = vpop.f32.mrf.mxu1 }
 0x14a   : > { %2425 = vst [vmem:[%s2965_s20 + $0x38] sm:$0xff] %v2297_v62   ;;  %v1497_v3 = vadd.f32 %v2951_v63, %v1209_v0  ;;  %v1132_v7 = vadd.f32 %v1131_v2, %v962_v1 }
 0x14c   : > { %v1561_v5 = vmax.f32 %v1497_v3, 0.0  ;;  %v1466_v12 = vadd.f32 %v2951_v63, %v1132_v7 }
 0x14e   : > { %v2377_v6 = vpack.c.bf16 %v1561_v5, %v1560_v4  ;;  %v1042_v8 = vpop.f32.mrf.mxu2  ;;  %v1530_v16 = vmax.f32 %v1466_v12, 0.0 }
 0x14f   : > { %v1211_v9 = vpop.f32.mrf.mxu3 }
 0x150   : > { %2441 = vst [vmem:[%s2965_s20 + $0xb8] sm:$0xff] %v2377_v6   ;;  %v964_v10 = vpop.f32.mrf.mxu0  ;;  %v1212_v14 = vadd.f32 %v1211_v9, %v1042_v8 }
 0x151   : > { %v1133_v11 = vpop.f32.mrf.mxu1 }
 0x152   : > { %v1134_v13 = vadd.f32 %v1133_v11, %v964_v10  ;;  %v1498_v20 = vadd.f32 %v2951_v63, %v1212_v14 }
 0x154   : > { %v1467_v15 = vadd.f32 %v2951_v63, %v1134_v13  ;;  %v1562_v26 = vmax.f32 %v1498_v20, 0.0 }
 0x156   : > { %v1531_v17 = vmax.f32 %v1467_v15, 0.0  ;;  %v1044_v18 = vpop.f32.mrf.mxu2 }
 0x157   : > { %v1213_v19 = vpop.f32.mrf.mxu3 }
 0x158   : > { %v2302_v21 = vpack.c.bf16 %v1531_v17, %v1530_v16  ;;  %v1214_v22 = vadd.f32 %v1213_v19, %v1044_v18  ;;  %v967_v23 = vpop.f32.mrf.mxu0 }
 0x159   : > { %v1136_v24 = vpop.f32.mrf.mxu1 }
 0x15a   : > { %2426 = vst [vmem:[%s2965_s20 + $0x40] sm:$0xff] %v2302_v21   ;;  %v1499_v25 = vadd.f32 %v2951_v63, %v1214_v22  ;;  %v1137_v29 = vadd.f32 %v1136_v24, %v967_v23 }
 0x15c   : > { %v1563_v27 = vmax.f32 %v1499_v25, 0.0  ;;  %v1468_v34 = vadd.f32 %v2951_v63, %v1137_v29 }
 0x15e   : > { %v2382_v28 = vpack.c.bf16 %v1563_v27, %v1562_v26  ;;  %v1047_v30 = vpop.f32.mrf.mxu2  ;;  %v1532_v38 = vmax.f32 %v1468_v34, 0.0 }
 0x15f   : > { %v1216_v31 = vpop.f32.mrf.mxu3 }
 0x160   : > { %2442 = vst [vmem:[%s2965_s20 + $0xc0] sm:$0xff] %v2382_v28   ;;  %v969_v32 = vpop.f32.mrf.mxu0  ;;  %v1217_v36 = vadd.f32 %v1216_v31, %v1047_v30 }
 0x161   : > { %v1138_v33 = vpop.f32.mrf.mxu1 }
 0x162   : > { %v1139_v35 = vadd.f32 %v1138_v33, %v969_v32  ;;  %v1500_v42 = vadd.f32 %v2951_v63, %v1217_v36 }
 0x164   : > { %v1469_v37 = vadd.f32 %v2951_v63, %v1139_v35  ;;  %v1564_v48 = vmax.f32 %v1500_v42, 0.0 }
 0x166   : > { %v1533_v39 = vmax.f32 %v1469_v37, 0.0  ;;  %v1049_v40 = vpop.f32.mrf.mxu2 }
 0x167   : > { %v1218_v41 = vpop.f32.mrf.mxu3 }
 0x168   : > { %v2307_v43 = vpack.c.bf16 %v1533_v39, %v1532_v38  ;;  %v1219_v44 = vadd.f32 %v1218_v41, %v1049_v40  ;;  %v972_v45 = vpop.f32.mrf.mxu0 }
 0x169   : > { %v1141_v46 = vpop.f32.mrf.mxu1 }
 0x16a   : > { %2427 = vst [vmem:[%s2965_s20 + $0x48] sm:$0xff] %v2307_v43   ;;  %v1501_v47 = vadd.f32 %v2951_v63, %v1219_v44  ;;  %v1142_v51 = vadd.f32 %v1141_v46, %v972_v45 }
 0x16c   : > { %v1565_v49 = vmax.f32 %v1501_v47, 0.0  ;;  %v1470_v56 = vadd.f32 %v2951_v63, %v1142_v51 }
 0x16e   : > { %v2387_v50 = vpack.c.bf16 %v1565_v49, %v1564_v48  ;;  %v1052_v52 = vpop.f32.mrf.mxu2  ;;  %v1534_v60 = vmax.f32 %v1470_v56, 0.0 }
 0x16f   : > { %v1221_v53 = vpop.f32.mrf.mxu3 }
 0x170   : > { %2443 = vst [vmem:[%s2965_s20 + $0xc8] sm:$0xff] %v2387_v50   ;;  %v974_v54 = vpop.f32.mrf.mxu0  ;;  %v1222_v58 = vadd.f32 %v1221_v53, %v1052_v52 }
 0x171   : > { %v1143_v55 = vpop.f32.mrf.mxu1 }
 0x172   : > { %v1144_v57 = vadd.f32 %v1143_v55, %v974_v54  ;;  %v1502_v1 = vadd.f32 %v2951_v63, %v1222_v58 }
 0x174   : > { %v1471_v59 = vadd.f32 %v2951_v63, %v1144_v57  ;;  %v1566_v7 = vmax.f32 %v1502_v1, 0.0 }
 0x176   : > { %v1535_v61 = vmax.f32 %v1471_v59, 0.0  ;;  %v1054_v62 = vpop.f32.mrf.mxu2 }
 0x177   : > { %v1223_v0 = vpop.f32.mrf.mxu3 }
 0x178   : > { %v2312_v2 = vpack.c.bf16 %v1535_v61, %v1534_v60  ;;  %v1224_v3 = vadd.f32 %v1223_v0, %v1054_v62  ;;  %v977_v4 = vpop.f32.mrf.mxu0 }
 0x179   : > { %v1146_v5 = vpop.f32.mrf.mxu1 }
 0x17a   : > { %2428 = vst [vmem:[%s2965_s20 + $0x50] sm:$0xff] %v2312_v2   ;;  %v1503_v6 = vadd.f32 %v2951_v63, %v1224_v3  ;;  %v1147_v10 = vadd.f32 %v1146_v5, %v977_v4 }
 0x17c   : > { %v1567_v8 = vmax.f32 %v1503_v6, 0.0  ;;  %v1472_v15 = vadd.f32 %v2951_v63, %v1147_v10 }
 0x17e   : > { %v2392_v9 = vpack.c.bf16 %v1567_v8, %v1566_v7  ;;  %v1057_v11 = vpop.f32.mrf.mxu2  ;;  %v1536_v19 = vmax.f32 %v1472_v15, 0.0 }
 0x17f   : > { %v1226_v12 = vpop.f32.mrf.mxu3 }
 0x180   : > { %2444 = vst [vmem:[%s2965_s20 + $0xd0] sm:$0xff] %v2392_v9   ;;  %v979_v13 = vpop.f32.mrf.mxu0  ;;  %v1227_v17 = vadd.f32 %v1226_v12, %v1057_v11 }
 0x181   : > { %v1148_v14 = vpop.f32.mrf.mxu1 }
 0x182   : > { %v1149_v16 = vadd.f32 %v1148_v14, %v979_v13  ;;  %v1504_v23 = vadd.f32 %v2951_v63, %v1227_v17 }
 0x184   : > { %v1473_v18 = vadd.f32 %v2951_v63, %v1149_v16  ;;  %v1568_v29 = vmax.f32 %v1504_v23, 0.0 }
 0x186   : > { %v1537_v20 = vmax.f32 %v1473_v18, 0.0  ;;  %v1059_v21 = vpop.f32.mrf.mxu2 }
 0x187   : > { %v1228_v22 = vpop.f32.mrf.mxu3 }
 0x188   : > { %v2317_v24 = vpack.c.bf16 %v1537_v20, %v1536_v19  ;;  %v1229_v25 = vadd.f32 %v1228_v22, %v1059_v21  ;;  %v982_v26 = vpop.f32.mrf.mxu0 }
 0x189   : > { %v1151_v27 = vpop.f32.mrf.mxu1 }
 0x18a   : > { %2429 = vst [vmem:[%s2965_s20 + $0x58] sm:$0xff] %v2317_v24   ;;  %v1505_v28 = vadd.f32 %v2951_v63, %v1229_v25  ;;  %v1152_v32 = vadd.f32 %v1151_v27, %v982_v26 }
 0x18c   : > { %v1569_v30 = vmax.f32 %v1505_v28, 0.0  ;;  %v1474_v37 = vadd.f32 %v2951_v63, %v1152_v32 }
 0x18e   : > { %v2397_v31 = vpack.c.bf16 %v1569_v30, %v1568_v29  ;;  %v1062_v33 = vpop.f32.mrf.mxu2  ;;  %v1538_v41 = vmax.f32 %v1474_v37, 0.0 }
 0x18f   : > { %v1231_v34 = vpop.f32.mrf.mxu3 }
 0x190   : > { %2445 = vst [vmem:[%s2965_s20 + $0xd8] sm:$0xff] %v2397_v31   ;;  %v984_v35 = vpop.f32.mrf.mxu0  ;;  %v1232_v39 = vadd.f32 %v1231_v34, %v1062_v33 }
 0x191   : > { %v1153_v36 = vpop.f32.mrf.mxu1 }
 0x192   : > { %v1154_v38 = vadd.f32 %v1153_v36, %v984_v35  ;;  %v1506_v45 = vadd.f32 %v2951_v63, %v1232_v39 }
 0x194   : > { %v1475_v40 = vadd.f32 %v2951_v63, %v1154_v38  ;;  %v1570_v51 = vmax.f32 %v1506_v45, 0.0 }
 0x196   : > { %v1539_v42 = vmax.f32 %v1475_v40, 0.0  ;;  %v1064_v43 = vpop.f32.mrf.mxu2 }
 0x197   : > { %v1233_v44 = vpop.f32.mrf.mxu3 }
 0x198   : > { %v2322_v46 = vpack.c.bf16 %v1539_v42, %v1538_v41  ;;  %v1234_v47 = vadd.f32 %v1233_v44, %v1064_v43  ;;  %v987_v48 = vpop.f32.mrf.mxu0 }
 0x199   : > { %v1156_v49 = vpop.f32.mrf.mxu1 }
 0x19a   : > { %2430 = vst [vmem:[%s2965_s20 + $0x60] sm:$0xff] %v2322_v46   ;;  %v1507_v50 = vadd.f32 %v2951_v63, %v1234_v47  ;;  %v1157_v54 = vadd.f32 %v1156_v49, %v987_v48 }
 0x19c   : > { %v1571_v52 = vmax.f32 %v1507_v50, 0.0  ;;  %v1476_v59 = vadd.f32 %v2951_v63, %v1157_v54 }
 0x19e   : > { %v2402_v53 = vpack.c.bf16 %v1571_v52, %v1570_v51  ;;  %v1067_v55 = vpop.f32.mrf.mxu2  ;;  %v1540_v0 = vmax.f32 %v1476_v59, 0.0 }
 0x19f   : > { %v1236_v56 = vpop.f32.mrf.mxu3 }
 0x1a0   : > { %2446 = vst [vmem:[%s2965_s20 + $0xe0] sm:$0xff] %v2402_v53   ;;  %v989_v57 = vpop.f32.mrf.mxu0  ;;  %v1237_v61 = vadd.f32 %v1236_v56, %v1067_v55 }
 0x1a1   : > { %v1158_v58 = vpop.f32.mrf.mxu1 }
 0x1a2   : > { %v1159_v60 = vadd.f32 %v1158_v58, %v989_v57  ;;  %v1508_v4 = vadd.f32 %v2951_v63, %v1237_v61 }
 0x1a4   : > { %v1477_v62 = vadd.f32 %v2951_v63, %v1159_v60  ;;  %v1572_v10 = vmax.f32 %v1508_v4, 0.0 }
 0x1a6   : > { %v1541_v1 = vmax.f32 %v1477_v62, 0.0  ;;  %v1069_v2 = vpop.f32.mrf.mxu2 }
 0x1a7   : > { %v1238_v3 = vpop.f32.mrf.mxu3 }
 0x1a8   : > { %v2327_v5 = vpack.c.bf16 %v1541_v1, %v1540_v0  ;;  %v1239_v6 = vadd.f32 %v1238_v3, %v1069_v2  ;;  %v992_v7 = vpop.f32.mrf.mxu0 }
 0x1a9   : > { %v1161_v8 = vpop.f32.mrf.mxu1 }
 0x1aa   : > { %2431 = vst [vmem:[%s2965_s20 + $0x68] sm:$0xff] %v2327_v5   ;;  %v1509_v9 = vadd.f32 %v2951_v63, %v1239_v6  ;;  %v1162_v13 = vadd.f32 %v1161_v8, %v992_v7 }
 0x1ac   : > { %v1573_v11 = vmax.f32 %v1509_v9, 0.0  ;;  %v1478_v18 = vadd.f32 %v2951_v63, %v1162_v13 }
 0x1ae   : > { %v2407_v12 = vpack.c.bf16 %v1573_v11, %v1572_v10  ;;  %v1072_v14 = vpop.f32.mrf.mxu2  ;;  %v1542_v22 = vmax.f32 %v1478_v18, 0.0 }
 0x1af   : > { %v1241_v15 = vpop.f32.mrf.mxu3 }
 0x1b0   : > { %2447 = vst [vmem:[%s2965_s20 + $0xe8] sm:$0xff] %v2407_v12   ;;  %v994_v16 = vpop.f32.mrf.mxu0  ;;  %v1242_v20 = vadd.f32 %v1241_v15, %v1072_v14 }
 0x1b1   : > { %v1163_v17 = vpop.f32.mrf.mxu1 }
 0x1b2   : > { %v1164_v19 = vadd.f32 %v1163_v17, %v994_v16  ;;  %v1510_v26 = vadd.f32 %v2951_v63, %v1242_v20 }
 0x1b4   : > { %v1479_v21 = vadd.f32 %v2951_v63, %v1164_v19  ;;  %v1574_v32 = vmax.f32 %v1510_v26, 0.0 }
 0x1b6   : > { %v1543_v23 = vmax.f32 %v1479_v21, 0.0  ;;  %v1074_v24 = vpop.f32.mrf.mxu2 }
 0x1b7   : > { %v1243_v25 = vpop.f32.mrf.mxu3 }
 0x1b8   : > { %v2332_v27 = vpack.c.bf16 %v1543_v23, %v1542_v22  ;;  %v1244_v28 = vadd.f32 %v1243_v25, %v1074_v24  ;;  %v997_v29 = vpop.f32.mrf.mxu0 }
 0x1b9   : > { %v1166_v30 = vpop.f32.mrf.mxu1 }
 0x1ba   : > { %2432 = vst [vmem:[%s2965_s20 + $0x70] sm:$0xff] %v2332_v27   ;;  %v1511_v31 = vadd.f32 %v2951_v63, %v1244_v28  ;;  %v1167_v35 = vadd.f32 %v1166_v30, %v997_v29 }
 0x1bc   : > { %v1575_v33 = vmax.f32 %v1511_v31, 0.0  ;;  %v1480_v40 = vadd.f32 %v2951_v63, %v1167_v35 }
 0x1be   : > { %v2412_v34 = vpack.c.bf16 %v1575_v33, %v1574_v32  ;;  %v1077_v36 = vpop.f32.mrf.mxu2  ;;  %v1544_v44 = vmax.f32 %v1480_v40, 0.0 }
 0x1bf   : > { %v1246_v37 = vpop.f32.mrf.mxu3 }
 0x1c0   : > { %2448 = vst [vmem:[%s2965_s20 + $0xf0] sm:$0xff] %v2412_v34   ;;  %v999_v38 = vpop.f32.mrf.mxu0  ;;  %v1247_v42 = vadd.f32 %v1246_v37, %v1077_v36 }
 0x1c1   : > { %v1168_v39 = vpop.f32.mrf.mxu1 }
 0x1c2   : > { %v1169_v41 = vadd.f32 %v1168_v39, %v999_v38  ;;  %v1512_v48 = vadd.f32 %v2951_v63, %v1247_v42 }
 0x1c4   : > { %v1481_v43 = vadd.f32 %v2951_v63, %v1169_v41  ;;  %v1576_v52 = vmax.f32 %v1512_v48, 0.0 }
 0x1c6   : > { %v1545_v45 = vmax.f32 %v1481_v43, 0.0  ;;  %v1079_v46 = vpop.f32.mrf.mxu2 }
 0x1c7   : > { %v1248_v47 = vpop.f32.mrf.mxu3 }
 0x1c8   : > { %v2337_v49 = vpack.c.bf16 %v1545_v45, %v1544_v44  ;;  %v1249_v50 = vadd.f32 %v1248_v47, %v1079_v46 }
 0x1ca   : > { %2433 = vst [vmem:[%s2965_s20 + $0x78] sm:$0xff] %v2337_v49   ;;  %v1513_v51 = vadd.f32 %v2951_v63, %v1249_v50 }
 0x1cc   : > { %v1577_v53 = vmax.f32 %v1513_v51, 0.0 }
 0x1ce   : > { %v2417_v54 = vpack.c.bf16 %v1577_v53, %v1576_v52 }
 0x1d0   : > { %2449 = vst [vmem:[%s2965_s20 + $0xf8] sm:$0xff] %v2417_v54  }
 0x1d1   : > { %2673 = shalt.err (!%p2670_p12)
}
 0x1d2   : > { %s2740_s11 = smov 64   ;;  %s2741_s26 = smov 4  }
 0x1d3   : > { %2476 = dma.vmem_to_hbm [thread:$0]  (%p2844_p5), %s1721_s30, 4096, %s1723_s15, %s1707_s4, %s2740_s11, %s2740_s11, %s2741_s26  }
 0x1d4 PF: > { %p2498_p13 = scmp.ge.s32.totalorder %s2732_s17, 2  ;;  %s1737_s28 = sand.u32 1, %s2712_s12  }
 0x1d5   : > { %s1738_s1 = scalar_lea.sflag [#allocation5], %s1737_s28 }
 0x1d6   : > { %p2490_p0 = pnand %p2498_p13, %p2811_p6 }
 0x1d8   : > { %p2491_p3 = pneg %p2490_p0 }
 0x1da   : > { %2707 = dma.done.wait (%p2491_p3), %s1738_s1, 4096  }
 0x1db   : > { %2709 = vsyncadd (%p2491_p3), %s1738_s1, 4294963200  ;;  %s20_s17 = sadd.s32 1, %s2732_s17   ;;  %s3159_s12 = smov %s2716_s13 }
 0x1dc   : > { %p17_p7 = scmp.ge.s32.totalorder %s20_s17, 51   ;;  %s3160_s13 = smov %s2720_s14 }
 0x1dd   : > { %s3161_s14 = smov %s2853_s29  ;;  %s3162_s15 = smov %s2728_s16 }
 0x1de   : > { %s3163_s16 = smov %s3165_s10  ;;  %19 = sbr.rel (!%p17_p7) target bundleno = 9 (0x9), region = 95 }
 0x1e3   :  { %1744 = vsyncpa [#allocation4], 1 }
 0x1e4   :  { %1746 = vsyncpa [#allocation4 + $0x1], 1 }
 0x1e5   :  { %1747 = vsyncpa [#allocation7], 1 }
 0x1e6   :  { %1748 = vsyncpa [#allocation5], 1 }
 0x1e7   :  { %1750 = vsyncpa [#allocation5 + $0x1], 1 }

</bundles_post_ra>
